<compile_context>
chip_gen: v7x
topology: tpu7x:2x2x1
jax: 0.10.0
libtpu: 0.0.40
codegen_flags: <defaults>
</compile_context>

<pallas_src>
import functools
import math

import jax
import jax.numpy as jnp
from jax import lax
from jax.experimental import pallas as pl
from jax.experimental.pallas import tpu as pltpu


def _round_up(x, m):
    return (x + m - 1) // m * m


def _vmem_capacity_bytes():
    try:
        return int(pltpu.get_tpu_info().vmem_capacity_bytes)
    except Exception:
        return 64 << 20  # conservative default (v7x per-TensorCore VMEM)


def _block_elems(shape):
    """Element count of a VMEM block after (8, 128) layout padding."""
    s = list(shape)
    s[-1] = _round_up(s[-1], 128)
    if len(s) >= 2:
        s[-2] = _round_up(s[-2], 8)
    n = 1
    for d in s:
        n *= d
    return n


def _step_bytes(tile_oh, wout, c4, cp, dtype_bytes=4):
    """Layout-aware VMEM bytes per grid step: double-buffered in/out blocks,
    weights/params, plus in-kernel slab copies and epilogue temps."""
    tile_n = tile_oh * wout
    in_blk = _block_elems((1, tile_oh + 1, wout + 1, c4)) * dtype_bytes
    out_blk = _block_elems((1, tile_n, cp)) * dtype_bytes
    w_blk = _block_elems((4, c4, cp)) * dtype_bytes
    p_blk = _block_elems((3, cp)) * dtype_bytes
    slabs = 4 * _block_elems((tile_n, c4)) * 4          # f32 tap-slab relayout copies
    acc = 2 * _block_elems((tile_n, cp)) * 4            # f32 accumulator + epilogue temps
    return 2 * (in_blk + out_blk) + 2 * (w_blk + p_blk) + slabs + acc


def _pick_tile_oh(hout, wout, c4, cp, budget):
    """Largest divisor of hout whose per-step VMEM footprint fits the budget."""
    for t in range(hout, 0, -1):
        if hout % t:
            continue
        if _step_bytes(t, wout, c4, cp) <= budget:
            return t
    return 1


def _merge_block_kernel(x_ref, w_ref, p_ref, o_ref, *, c_out, eps):
    """One grid step = one (batch, output-row-tile).

    x_ref : (1, TILE_OH+1, Wout+1, 4C)  packed parity planes (+1-row/col halo)
    w_ref : (4, 4C, Cp)                 per-shift conv weights (lane-padded)
    p_ref : (3, Cp)                     [bias; gamma; beta], padded cols zero
    o_ref : (1, TILE_N, Cp)             TILE_N = TILE_OH * Wout
    """
    tile_oh = x_ref.shape[1] - 1
    wout = x_ref.shape[2] - 1
    c4 = x_ref.shape[3]
    tile_n, cp = o_ref.shape[1], o_ref.shape[2]

    x = x_ref[0]                                          # (TILE_OH+1, Wout+1, 4C)

    # 3x3 stride-2 conv == 4 shifted dots over the packed parity channels.
    # Accumulate in a Python value (registers), not a VMEM scratch.
    acc = None
    for dr in range(2):
        for dc in range(2):
            slab = x[dr:dr + tile_oh, dc:dc + wout, :].reshape(tile_n, c4)
            part = jnp.dot(slab, w_ref[dr * 2 + dc],
                           preferred_element_type=jnp.float32)
            acc = part if acc is None else acc + part

    params = p_ref[...]
    bias, gamma, beta = params[0:1], params[1:2], params[2:3]

    y = acc + bias                                        # padded lanes stay 0
    # exact (erf-based) GELU, matching torch nn.GELU() default; GELU(0)=0 keeps pads 0
    y = 0.5 * y * (1.0 + lax.erf(y * (1.0 / math.sqrt(2.0))))

    # LayerNorm over the *true* c_out channels (biased variance, torch eps placement)
    mean = jnp.sum(y, axis=-1, keepdims=True) * (1.0 / c_out)
    centered = y - mean
    if cp != c_out:
        lane = lax.broadcasted_iota(jnp.int32, (1, cp), 1)
        centered = jnp.where(lane < c_out, centered, 0.0)
    var = jnp.sum(centered * centered, axis=-1, keepdims=True) * (1.0 / c_out)
    xn = centered * lax.rsqrt(var + eps)
    o_ref[0] = (xn * gamma + beta).astype(o_ref.dtype)    # padded gamma/beta = 0


def merge_block_forward(x, conv_w, conv_b, ln_gamma, ln_beta, resolution,
                        *, tile_oh=None, eps=1e-5):
    """x: (B, H*W, C); conv_w: (C_out, C, 3, 3) torch OIHW; -> (B, Hout*Wout, C_out)."""
    B, N, C = x.shape
    H, W = resolution
    assert N == H * W
    assert H % 2 == 0 and W % 2 == 0, "stride-2 merge expects even H, W"
    Hout, Wout = H // 2, W // 2
    C_out = conv_w.shape[0]
    Cp = max(128, _round_up(C_out, 128))                  # lane-dense channel width
    C4 = 4 * C

    # ---- layout glue: pad + parity (space-to-depth) split, packed into one tensor
    x_pad = jnp.pad(x.reshape(B, H, W, C), ((0, 0), (1, 1), (1, 1), (0, 0)))
    planes = [x_pad[:, pr:pr + 2 * Hout + 1:2, pc:pc + 2 * Wout + 1:2, :]
              for pr in (0, 1) for pc in (0, 1)]
    packed = jnp.concatenate(planes, axis=-1)             # (B, Hout+1, Wout+1, 4C)

    # ---- tile selection (layout-aware VMEM model, per-chip capacity)
    phys = _vmem_capacity_bytes()
    cap = (40 << 20) if phys <= (64 << 20) else (96 << 20)
    budget = cap - (8 << 20)
    if tile_oh is None:
        tile_oh = _pick_tile_oh(Hout, Wout, C4, Cp, budget)
        if B * (Hout // tile_oh) < 2:   # keep >=2 grid steps for 2-TC chips (v7x)
            for t in range(tile_oh - 1, 0, -1):
                if Hout % t == 0 and _step_bytes(t, Wout, C4, Cp) <= budget:
                    tile_oh = t
                    break
    assert Hout % tile_oh == 0
    n_tiles = Hout // tile_oh
    tile_n = tile_oh * Wout

    if n_tiles == 1:
        bands = packed                                     # no band-stack HBM pass
    else:
        bands = jnp.stack([packed[:, t * tile_oh:t * tile_oh + tile_oh + 1]
                           for t in range(n_tiles)], axis=1)
        bands = bands.reshape(B * n_tiles, tile_oh + 1, Wout + 1, C4)

    # ---- per-shift weights: shift (dr,dc) x parity (pr,pc) -> tap (2dr+pr, 2dc+pc)
    w_slab = jnp.zeros((4, C4, Cp), jnp.float32)
    for dr in range(2):
        for dc in range(2):
            for pr in range(2):
                for pc in range(2):
                    kh, kw = 2 * dr + pr, 2 * dc + pc
                    if kh <= 2 and kw <= 2:
                        blk = jnp.transpose(conv_w[:, :, kh, kw])       # (C, C_out)
                        blk = jnp.pad(blk, ((0, 0), (0, Cp - C_out)))
                        p = pr * 2 + pc
                        w_slab = w_slab.at[dr * 2 + dc,
                                           p * C:(p + 1) * C, :].set(
                                               blk.astype(jnp.float32))

    # Fused [bias; gamma; beta] operand; padded columns zero (keeps padded lanes 0).
    params = jnp.stack([conv_b, ln_gamma, ln_beta], axis=0)
    params = jnp.pad(params, ((0, 0), (0, Cp - C_out))).astype(jnp.float32)

    need = _step_bytes(tile_oh, Wout, C4, Cp)
    vmem_limit = int(min(max(need + (8 << 20), 32 << 20), cap))

    out = pl.pallas_call(
        functools.partial(_merge_block_kernel, c_out=C_out, eps=eps),
        out_shape=jax.ShapeDtypeStruct((B * n_tiles, tile_n, Cp), x.dtype),
        grid=(B * n_tiles,),
        in_specs=[
            pl.BlockSpec((1, tile_oh + 1, Wout + 1, C4), lambda i: (i, 0, 0, 0)),
            pl.BlockSpec((4, C4, Cp), lambda i: (0, 0, 0)),
            pl.BlockSpec((3, Cp), lambda i: (0, 0)),
        ],
        out_specs=pl.BlockSpec((1, tile_n, Cp), lambda i: (i, 0, 0)),
        compiler_params=pltpu.CompilerParams(
            dimension_semantics=("parallel",),
            vmem_limit_bytes=vmem_limit),
    )(bands, w_slab, params)

    out = out.reshape(B, Hout * Wout, Cp)
    if Cp != C_out:
        out = out[:, :, :C_out]
    return out


def merge_block_reference(x, conv_w, conv_b, ln_gamma, ln_beta, resolution):
    """Plain-JAX reference matching the PyTorch forward (NCHW conv path)."""
    B, N, C = x.shape
    H, W = resolution
    x_nchw = jnp.transpose(x, (0, 2, 1)).reshape(B, C, H, W)
    y = lax.conv_general_dilated(
        x_nchw, conv_w, window_strides=(2, 2), padding=((1, 1), (1, 1)),
        dimension_numbers=("NCHW", "OIHW", "NCHW"))
    y = y + conv_b.reshape(1, -1, 1, 1)
    y = jax.nn.gelu(y, approximate=False)
    Bc, Co = y.shape[:2]
    y = jnp.transpose(y.reshape(Bc, Co, -1), (0, 2, 1))
    mean = jnp.mean(y, axis=-1, keepdims=True)
    var = jnp.mean((y - mean) ** 2, axis=-1, keepdims=True)
    return (y - mean) / jnp.sqrt(var + 1e-5) * ln_gamma + ln_beta


if __name__ == "__main__":
    # Small shapes consistent with the module: dim=4, dim_out=8, resolution 16x16
    B, C, H, W = 2, 4, 16, 16
    C_out = 8
    key = jax.random.PRNGKey(0)
    kx, kw, kb = jax.random.split(key, 3)

    x = jax.random.normal(kx, (B, H * W, C), dtype=jnp.float32)
    conv_w = 0.1 * jax.random.normal(kw, (C_out, C, 3, 3), dtype=jnp.float32)
    conv_b = 0.1 * jax.random.normal(kb, (C_out,), dtype=jnp.float32)
    ln_gamma = jnp.ones((C_out,), dtype=jnp.float32)   # torch LayerNorm default init
    ln_beta = jnp.zeros((C_out,), dtype=jnp.float32)

    out = merge_block_forward(x, conv_w, conv_b, ln_gamma, ln_beta, (H, W))
    out = jax.block_until_ready(out)

    ref = merge_block_reference(x, conv_w, conv_b, ln_gamma, ln_beta, (H, W))
    assert out.shape == (B, (H // 2) * (W // 2), C_out), out.shape
    assert jnp.allclose(out, ref, atol=1e-4, rtol=1e-4), "mismatch vs reference"

    print("KERNEL_OK")
</pallas_src>

<mosaic_0001>
module attributes {stable_mosaic.version = 11 : i64} {
  func.func @_merge_block_kernel(%arg0: i32, %arg1: memref<1x9x9x16xf32, #tpu.memory_space<vmem>>, %arg2: memref<4x16x128xf32, #tpu.memory_space<vmem>>, %arg3: memref<3x128xf32, #tpu.memory_space<vmem>>, %arg4: memref<1x64x128xf32, #tpu.memory_space<vmem>>) attributes {dimension_semantics = [#tpu.dimension_semantics<parallel>], iteration_bounds = array<i64: 2>, scalar_prefetch = 0 : i64, scratch_operands = 0 : i64, tpu.core_type = #tpu.core_type<tc>, window_params = [{transform_indices = @transform_0, window_bounds = array<i64: 1, 9, 9, 16>}, {pipeline_mode = #tpu.pipeline_mode<synchronous>, transform_indices = @transform_1, window_bounds = array<i64: 4, 16, 128>}, {pipeline_mode = #tpu.pipeline_mode<synchronous>, transform_indices = @transform_2, window_bounds = array<i64: 3, 128>}, {transform_indices = @transform_3, window_bounds = array<i64: 1, 64, 128>}]} {
    %c0 = arith.constant 0 : index
    %c0_0 = arith.constant 0 : index
    %c0_1 = arith.constant 0 : index
    %c0_2 = arith.constant 0 : index
    %0 = vector.load %arg1[%c0, %c0_0, %c0_1, %c0_2] : memref<1x9x9x16xf32, #tpu.memory_space<vmem>>, vector<1x9x9x16xf32>
    %1 = vector.shape_cast %0 : vector<1x9x9x16xf32> to vector<9x9x16xf32>
    %2 = vector.extract_strided_slice %1 {offsets = [0, 0, 0], sizes = [8, 8, 16], strides = [1, 1, 1]} : vector<9x9x16xf32> to vector<8x8x16xf32>
    %3 = vector.shape_cast %2 : vector<8x8x16xf32> to vector<64x16xf32>
    %c0_3 = arith.constant 0 : index
    %c0_4 = arith.constant 0 : index
    %c0_5 = arith.constant 0 : index
    %4 = vector.load %arg2[%c0_3, %c0_4, %c0_5] : memref<4x16x128xf32, #tpu.memory_space<vmem>>, vector<1x16x128xf32>
    %5 = vector.shape_cast %4 : vector<1x16x128xf32> to vector<16x128xf32>
    %cst = arith.constant dense<0.000000e+00> : vector<64x128xf32>
    %6 = tpu.matmul %3, %5, %cst {dimension_numbers = #tpu.dot_dimension_numbers<[1], [0], [0], [1], [0, 0, 1, 1], [], []>} : vector<64x16xf32>, vector<16x128xf32>, vector<64x128xf32> -> vector<64x128xf32>
    %7 = vector.extract_strided_slice %1 {offsets = [0, 1, 0], sizes = [8, 8, 16], strides = [1, 1, 1]} : vector<9x9x16xf32> to vector<8x8x16xf32>
    %8 = vector.shape_cast %7 : vector<8x8x16xf32> to vector<64x16xf32>
    %c1 = arith.constant 1 : index
    %c0_6 = arith.constant 0 : index
    %c0_7 = arith.constant 0 : index
    %9 = vector.load %arg2[%c1, %c0_6, %c0_7] : memref<4x16x128xf32, #tpu.memory_space<vmem>>, vector<1x16x128xf32>
    %10 = vector.shape_cast %9 : vector<1x16x128xf32> to vector<16x128xf32>
    %cst_8 = arith.constant dense<0.000000e+00> : vector<64x128xf32>
    %11 = tpu.matmul %8, %10, %cst_8 {dimension_numbers = #tpu.dot_dimension_numbers<[1], [0], [0], [1], [0, 0, 1, 1], [], []>} : vector<64x16xf32>, vector<16x128xf32>, vector<64x128xf32> -> vector<64x128xf32>
    %12 = arith.addf %6, %11 : vector<64x128xf32>
    %13 = vector.extract_strided_slice %1 {offsets = [1, 0, 0], sizes = [8, 8, 16], strides = [1, 1, 1]} : vector<9x9x16xf32> to vector<8x8x16xf32>
    %14 = vector.shape_cast %13 : vector<8x8x16xf32> to vector<64x16xf32>
    %c2 = arith.constant 2 : index
    %c0_9 = arith.constant 0 : index
    %c0_10 = arith.constant 0 : index
    %15 = vector.load %arg2[%c2, %c0_9, %c0_10] : memref<4x16x128xf32, #tpu.memory_space<vmem>>, vector<1x16x128xf32>
    %16 = vector.shape_cast %15 : vector<1x16x128xf32> to vector<16x128xf32>
    %cst_11 = arith.constant dense<0.000000e+00> : vector<64x128xf32>
    %17 = tpu.matmul %14, %16, %cst_11 {dimension_numbers = #tpu.dot_dimension_numbers<[1], [0], [0], [1], [0, 0, 1, 1], [], []>} : vector<64x16xf32>, vector<16x128xf32>, vector<64x128xf32> -> vector<64x128xf32>
    %18 = arith.addf %12, %17 : vector<64x128xf32>
    %19 = vector.extract_strided_slice %1 {offsets = [1, 1, 0], sizes = [8, 8, 16], strides = [1, 1, 1]} : vector<9x9x16xf32> to vector<8x8x16xf32>
    %20 = vector.shape_cast %19 : vector<8x8x16xf32> to vector<64x16xf32>
    %c3 = arith.constant 3 : index
    %c0_12 = arith.constant 0 : index
    %c0_13 = arith.constant 0 : index
    %21 = vector.load %arg2[%c3, %c0_12, %c0_13] : memref<4x16x128xf32, #tpu.memory_space<vmem>>, vector<1x16x128xf32>
    %22 = vector.shape_cast %21 : vector<1x16x128xf32> to vector<16x128xf32>
    %cst_14 = arith.constant dense<0.000000e+00> : vector<64x128xf32>
    %23 = tpu.matmul %20, %22, %cst_14 {dimension_numbers = #tpu.dot_dimension_numbers<[1], [0], [0], [1], [0, 0, 1, 1], [], []>} : vector<64x16xf32>, vector<16x128xf32>, vector<64x128xf32> -> vector<64x128xf32>
    %24 = arith.addf %18, %23 : vector<64x128xf32>
    %c0_15 = arith.constant 0 : index
    %c0_16 = arith.constant 0 : index
    %25 = vector.load %arg3[%c0_15, %c0_16] : memref<3x128xf32, #tpu.memory_space<vmem>>, vector<3x128xf32>
    %26 = vector.extract_strided_slice %25 {offsets = [0, 0], sizes = [1, 128], strides = [1, 1]} : vector<3x128xf32> to vector<1x128xf32>
    %27 = vector.extract_strided_slice %25 {offsets = [1, 0], sizes = [1, 128], strides = [1, 1]} : vector<3x128xf32> to vector<1x128xf32>
    %28 = vector.extract_strided_slice %25 {offsets = [2, 0], sizes = [1, 128], strides = [1, 1]} : vector<3x128xf32> to vector<1x128xf32>
    %29 = vector.broadcast %26 : vector<1x128xf32> to vector<64x128xf32>
    %30 = arith.addf %24, %29 : vector<64x128xf32>
    %cst_17 = arith.constant 5.000000e-01 : f32
    %31 = vector.broadcast %cst_17 : f32 to vector<64x128xf32>
    %32 = arith.mulf %31, %30 : vector<64x128xf32>
    %cst_18 = arith.constant 0.707106769 : f32
    %33 = vector.broadcast %cst_18 : f32 to vector<64x128xf32>
    %34 = arith.mulf %30, %33 : vector<64x128xf32>
    %35 = math.erf %34 : vector<64x128xf32>
    %cst_19 = arith.constant 1.000000e+00 : f32
    %36 = vector.broadcast %cst_19 : f32 to vector<64x128xf32>
    %37 = arith.addf %36, %35 : vector<64x128xf32>
    %38 = arith.mulf %32, %37 : vector<64x128xf32>
    %cst_20 = arith.constant dense<0.000000e+00> : vector<64xf32>
    %39 = vector.multi_reduction <add>, %38, %cst_20 [1] : vector<64x128xf32> to vector<64xf32>
    %40 = vector.shape_cast %39 : vector<64xf32> to vector<64x1xf32>
    %cst_21 = arith.constant 1.250000e-01 : f32
    %41 = vector.broadcast %cst_21 : f32 to vector<64x1xf32>
    %42 = arith.mulf %40, %41 : vector<64x1xf32>
    %43 = vector.broadcast %42 : vector<64x1xf32> to vector<64x128xf32>
    %44 = arith.subf %38, %43 : vector<64x128xf32>
    %45 = tpu.iota {dimensions = array<i32: 1>} : vector<1x128xi32>
    %c8_i32 = arith.constant 8 : i32
    %46 = vector.broadcast %c8_i32 : i32 to vector<1x128xi32>
    %47 = arith.cmpi slt, %45, %46 : vector<1x128xi32>
    %cst_22 = arith.constant 0.000000e+00 : f32
    %48 = vector.shape_cast %47 : vector<1x128xi1> to vector<1x128xi1>
    %49 = vector.broadcast %48 : vector<1x128xi1> to vector<64x128xi1>
    %50 = vector.broadcast %cst_22 : f32 to vector<64x128xf32>
    %51 = arith.select %49, %44, %50 : vector<64x128xi1>, vector<64x128xf32>
    %52 = arith.mulf %51, %51 : vector<64x128xf32>
    %cst_23 = arith.constant dense<0.000000e+00> : vector<64xf32>
    %53 = vector.multi_reduction <add>, %52, %cst_23 [1] : vector<64x128xf32> to vector<64xf32>
    %54 = vector.shape_cast %53 : vector<64xf32> to vector<64x1xf32>
    %cst_24 = arith.constant 1.250000e-01 : f32
    %55 = vector.broadcast %cst_24 : f32 to vector<64x1xf32>
    %56 = arith.mulf %54, %55 : vector<64x1xf32>
    %cst_25 = arith.constant 9.99999974E-6 : f32
    %57 = vector.broadcast %cst_25 : f32 to vector<64x1xf32>
    %58 = arith.addf %56, %57 : vector<64x1xf32>
    %59 = math.rsqrt %58 : vector<64x1xf32>
    %60 = vector.broadcast %59 : vector<64x1xf32> to vector<64x128xf32>
    %61 = arith.mulf %51, %60 : vector<64x128xf32>
    %62 = vector.broadcast %27 : vector<1x128xf32> to vector<64x128xf32>
    %63 = arith.mulf %61, %62 : vector<64x128xf32>
    %64 = vector.broadcast %28 : vector<1x128xf32> to vector<64x128xf32>
    %65 = arith.addf %63, %64 : vector<64x128xf32>
    %c0_26 = arith.constant 0 : index
    %c0_27 = arith.constant 0 : index
    %c0_28 = arith.constant 0 : index
    %66 = vector.load %arg4[%c0_26, %c0_27, %c0_28] : memref<1x64x128xf32, #tpu.memory_space<vmem>>, vector<1x64x128xf32>
    %67 = vector.shape_cast %66 : vector<1x64x128xf32> to vector<64x128xf32>
    %68 = vector.shape_cast %65 : vector<64x128xf32> to vector<1x64x128xf32>
    tpu.vector_store %arg4[%c0_26, %c0_27, %c0_28], %68 {strides = array<i32>} : memref<1x64x128xf32, #tpu.memory_space<vmem>>, vector<1x64x128xf32>,
    return
  }
  func.func @transform_0(%arg0: i32) -> (i32, i32, i32, i32) {
    %c0_i32 = arith.constant 0 : i32
    %c0_i32_0 = arith.constant 0 : i32
    %c0_i32_1 = arith.constant 0 : i32
    %c0_i32_2 = arith.constant 0 : i32
    return %arg0, %c0_i32, %c0_i32_0, %c0_i32_1 : i32, i32, i32, i32
  }
  func.func @transform_1(%arg0: i32) -> (i32, i32, i32) {
    %c0_i32 = arith.constant 0 : i32
    %c0_i32_0 = arith.constant 0 : i32
    %c0_i32_1 = arith.constant 0 : i32
    %c0_i32_2 = arith.constant 0 : i32
    return %c0_i32, %c0_i32_0, %c0_i32_1 : i32, i32, i32
  }
  func.func @transform_2(%arg0: i32) -> (i32, i32) {
    %c0_i32 = arith.constant 0 : i32
    %c0_i32_0 = arith.constant 0 : i32
    %c0_i32_1 = arith.constant 0 : i32
    return %c0_i32, %c0_i32_0 : i32, i32
  }
  func.func @transform_3(%arg0: i32) -> (i32, i32, i32) {
    %c0_i32 = arith.constant 0 : i32
    %c0_i32_0 = arith.constant 0 : i32
    %c0_i32_1 = arith.constant 0 : i32
    return %arg0, %c0_i32, %c0_i32_0 : i32, i32, i32
  }
}

</mosaic_0001>

<bundles_post_ra>
// kernel: tpu_custom_call.1
= control target key start
LH: loop header
LB: loop body
LE: loop exit
PB: predicated region body
PF: predicated region fallthrough
CT: control target
= control target key end

     0   :  { %8 = vsyncpa [#allocation3], 0  ;;  %s1625_s0 = inlined_call_operand.vmem [shape: f32[2,9,9,16], index: 0, kind: input, shape index: {}]   ;;  %s1626_s1 = inlined_call_operand.vmem [shape: f32[4,16,128], index: 1, kind: input, shape index: {}]   ;;  %s1627_s2 = inlined_call_operand.vmem [shape: f32[3,128], index: 2, kind: input, shape index: {}]   ;;  %s1628_s3 = inlined_call_operand.hbm [shape: f32[2,64,128], index: 3, kind: output, shape index: {}]  }
   0x1   :  { %10 = vsyncpa [#allocation3 + $0x1], 0  ;;  %s1334_s12 = smov 0   ;;  %s1336_s13 = smov 0  }
   0x2   :  { %s1338_s14 = smov 0   ;;  %s1340_s15 = smov 0  }
   0x3 LB: > { %s1355_s16 = sadd.s32 4294967295, %s1309_s15   ;;  %s979_s17 = sadd.s32 4294967294, %s1309_s15   ;;  %s1309_s15 = sphi %s1340_s15, %s1634_s15   ;;  %s1305_s14 = sphi %s1338_s14, %s1633_s14   ;;  %s1301_s13 = sphi %s1336_s13, %s1632_s13   ;;  %s1297_s12 = sphi %s1334_s12, %s1631_s12  }
   0x4   : > { %s1359_s18 = sadd.s32 1, %s1309_s15   ;;  %s91_s19 = sadd.s32 1, %s1305_s14 }
   0x5   : > { %s88_s20 = ssub.s32 %s1309_s15, %s1359_s18  ;;  %p101_p0 = scmp.ne.s32.totalorder %s1305_s14, %s1301_s13 }
   0x6   : > { %p89_p1 = scmp.eq.s32.totalorder %s88_s20, 0  ;;  %p102_p2 = scmp.eq.s32.totalorder %s1355_s16, 1 }
   0x7   : > { %p107_p3 = scmp.ne.s32.totalorder %s1301_s13, %s1297_s12  ;;  %p108_p4 = scmp.eq.s32.totalorder %s979_s17, 1 }
   0x8   : > { %s1370_s21 = scalar_select %p89_p1, %s1305_s14, %s91_s19  }
   0x9   : > { %p1372_p5 = por %p102_p2, %p101_p0  ;;  %p1376_p6 = por %p108_p4, %p107_p3 }
   0xa   : > { %p982_p7 = scmp.ge.s32.totalorder %s1309_s15, 1  ;;  %p140_p8 = scmp.lt.s32.totalorder %s1309_s15, 3 }
   0xc   : > { %p141_p9 = pnand %p982_p7, %p140_p8 }
   0xd   : > { %v1003_v0 = vld [vmem:[%s1626_s1 + $0x20] sm:$0xff] (!%p141_p9)  ;;  %v1004_v1 = vld [vmem:[%s1626_s1 + $0x28] sm:$0xff] (!%p141_p9)  ;;  %v985_v2 = vld [vmem:[%s1626_s1 + $0x10] sm:$0xff] (!%p141_p9)  ;;  %p164_p10 = scmp.lt.s32.totalorder (!%p141_p9), %s1355_s16, 1  ;;  %vm233_vm0 = vcmask (!%p141_p9), 130048   ;;  %vm205_vm1 = vcmask (!%p141_p9), 1046528   ;;  %v718_v57 = vlaneseq (!%p141_p9) }
   0xe   : > { %144 = sbr.rel (%p141_p9) target bundleno = 625 (0x271), region = 32  ;;  %v1141_v3 = vpack.c.bf16 (!%p141_p9), %v1004_v1, %v1003_v0  ;;  %v986_v4 = vld [vmem:[%s1626_s1 + $0x18] sm:$0xff] (!%p141_p9)  ;;  %v187_v5 = vld [vmem:[%s1626_s1] sm:$0xff] (!%p141_p9)  ;;  %v188_v6 = vld [vmem:[%s1626_s1 + $0x8] sm:$0xff] (!%p141_p9)  ;;  %s161_s29 = sand.u32 (!%p141_p9), 1, %s1301_s13  }
   0xf   : > { %v1133_v7 = vpack.c.bf16 (!%p141_p9), %v986_v4, %v985_v2  ;;  %v1137_v8 = vpack.c.bf16 (!%p141_p9), %v188_v6, %v187_v5  ;;  %v1013_v9 = vld [vmem:[%s1626_s1 + $0x30] sm:$0xff] (!%p141_p9)  ;;  %v1014_v10 = vld [vmem:[%s1626_s1 + $0x38] sm:$0xff] (!%p141_p9)  ;;  %v719_v58 = vshrl.u32 (!%p141_p9), %v718_v57, 7  ;;  %v717_v61 = vld [vmem:[%s1627_s2] sm:$0x7] (!%p141_p9)  ;;  %s983_s30 = sshll.u32 (!%p141_p9), %s161_s29, 6 }
  0x10   : > { %1142 = vmatprep.subr.bf16.mxu0 (!%p141_p9), %v1141_v3  ;;  %v1145_v11 = vpack.c.bf16 (!%p141_p9), %v1014_v10, %v1013_v9  ;;  %s1544_s4 = scalar_lea.vmem (!%p141_p9), [#allocation2], %s983_s30  ;;  %s1028_s5 = sshll.u32 (!%p141_p9), %s1355_s16, 10 }
  0x11   : > { %1144 = vmatpush3.bf16.msra.mxu0 (!%p141_p9), %v1141_v3  ;;  %1134 = vmatprep.subr.bf16.mxu1 (!%p141_p9), %v1133_v7  ;;  %v873_v59 = vsub.s32 (!%p141_p9), 1, %v719_v58  ;;  %v885_v60 = vsub.s32 (!%p141_p9), 2, %v719_v58  ;;  %v720_v0 = vsub.s32 (!%p141_p9), 0, %v719_v58  ;;  %s917_s6 = sshll.u32 (!%p141_p9), %s1544_s4, 4  ;;  %s1311_s11 = smov (!%p141_p9), [#allocation2]   ;;  %s1577_s6 = int_to_ptr.vmem [resolvable:$true] %s917_s6 }
  0x12   : > { %1136 = vmatpush3.bf16.msra.mxu1 (!%p141_p9), %v1133_v7  ;;  %1146 = vmatprep.subr.bf16.mxu0 (!%p141_p9), %v1145_v11  ;;  %s1247_s10 = scalar_lea.vmem (!%p141_p9), %s1577_s6, 1024  ;;  %s1251_s17 = sshll.u32 (!%p141_p9), %s1311_s11, 4  ;;  %s1252_s17 = int_to_ptr.vmem [resolvable:$false] %s1251_s17 }
  0x13   : > { %1138 = vmatprep.subr.bf16.mxu1 (!%p141_p9), %v1137_v8  ;;  %v1491_v62 = vrot.slane (!%p141_p9), %v717_v61, %v873_v59  ;;  %v1493_v63 = vrot.slane (!%p141_p9), %v717_v61, %v885_v60  ;;  %v721_v3 = vrot.slane (!%p141_p9), %v717_v61, %v720_v0  ;;  %p1248_p11 = scmp.ne.s32.totalorder (!%p141_p9), %s1577_s6, %s1247_s10  ;;  %s1253_s19 = scalar_lea.vmem (!%p141_p9), %s1252_s17, 2048 }
  0x14   : > { %p1254_p0 = scmp.lt.s32.totalorder (!%p141_p9), %s1577_s6, %s1252_s17  ;;  %p1255_p1 = scmp.lt.s32.totalorder (!%p141_p9), %s1253_s19, %s1247_s10 }
  0x15   : > { %s165_s9 = scalar_select %p164_p10, %s1355_s16, 1 }
  0x16   : > { %s1584_s16 = scalar_lea.sflag [#allocation3], %s161_s29  ;;  %p1249_p12 = pnand %p1248_p11, %p1372_p5 }
  0x17   : > { %s1173_s20 = smul.u32 144, %s165_s9  ;;  %s1575_s9 = scalar_lea.hbm %s1628_s3, %s1028_s5 }
  0x18   : > { %p1250_p13 = pneg %p1249_p12  ;;  %p1256_p2 = por %p1255_p1, %p1254_p0 }
  0x19   : > { %s1411_s26 = scalar_lea.vmem %s1625_s0, %s1173_s20 }
  0x1a   : > { %v1414_v12 = vld [vmem:[%s1411_s26 + $0x10] sm:$0xff]  ;;  %v1417_v13 = vld [vmem:[%s1411_s26 + $0x20] sm:$0xff]  ;;  %v170_v16 = vld [vmem:[%s1411_s26 + $0x8] sm:$0x1]  ;;  %p1257_p3 = pnand %p1256_p2, %p1250_p13 }
  0x1b   : > { %v169_v14 = vld [vmem:[%s1411_s26] sm:$0xff]  ;;  %v209_v15 = vrot.slane %v1414_v12, 1  ;;  %1105 = vmatprep.mubr.msk.f32.mxu0 %vm233_vm0, %v1414_v12  ;;  %v1425_v18 = vld [vmem:[%s1411_s26 + $0x30] sm:$0xff]  ;;  %v212_v19 = vrot.slane %v1417_v13, 1  ;;  %v207_v20 = vrot.slane %v170_v16, 1 }
  0x1c   : > { %v206_v17 = vrot.slane %v169_v14, 1  ;;  %1106 = vmatmul.mubr.msk.f32.vlgmr.msra.gmra.mrb[0].mxu0 %vm233_vm0, %v1417_v13  ;;  %v172_v21 = vld [vmem:[%s1411_s26 + $0x18] sm:$0x1]  ;;  %v215_v22 = vrot.slane %v1425_v18, 1  ;;  %v177_v24 = vld [vmem:[%s1411_s26 + $0x40] sm:$0xff]  ;;  %v179_v31 = vld [vmem:[%s1411_s26 + $0x50] sm:$0xff] }
  0x1d   : > { %v210_v23 = vrot.slane %v172_v21, 1  ;;  %1108 = vmatprep.mubr.msk.f32.mxu0 %vm233_vm0, %v1425_v18  ;;  %1148 = vmatpush3.bf16.msra.mxu0 %v1145_v11  ;;  %v174_v25 = vld [vmem:[%s1411_s26 + $0x28] sm:$0x1]  ;;  %v176_v26 = vld [vmem:[%s1411_s26 + $0x38] sm:$0x1]  ;;  %v218_v28 = vrot.slane %v177_v24, 1 }
  0x1e   : > { %v208_v27 = vsel %vm205_vm1, %v206_v17, %v207_v20  ;;  %v213_v29 = vrot.slane %v174_v25, 1  ;;  %v216_v30 = vrot.slane %v176_v26, 1  ;;  %v178_v32 = vld [vmem:[%s1411_s26 + $0x48] sm:$0x1]  ;;  %v180_v35 = vld [vmem:[%s1411_s26 + $0x58] sm:$0x1] }
  0x1f   : > { %1073 = vmatprep.mubr.msk.f32.mxu1 %vm233_vm0, %v208_v27  ;;  %v211_v33 = vsel %vm205_vm1, %v209_v15, %v210_v23  ;;  %v219_v34 = vrot.slane %v178_v32, 1  ;;  %v182_v37 = vld [vmem:[%s1411_s26 + $0x68] sm:$0x1]  ;;  %v221_v39 = vrot.slane %v179_v31, 1  ;;  %v181_v40 = vld [vmem:[%s1411_s26 + $0x60] sm:$0xff]  ;;  %v222_v41 = vrot.slane %v180_v35, 1 }
  0x20   : > { %1074 = vmatmul.mubr.msk.f32.vlgmr.msra.gmra.mrb[0].mxu1 %vm233_vm0, %v211_v33  ;;  %1109 = vmatmul.mubr.msk.f32.gmra.mrb[2].mxu0 %vm233_vm0, %v177_v24  ;;  %v214_v36 = vsel %vm205_vm1, %v212_v19, %v213_v29  ;;  %v217_v38 = vsel %vm205_vm1, %v215_v22, %v216_v30  ;;  %v224_v42 = vrot.slane %v181_v40, 1  ;;  %v183_v44 = vld [vmem:[%s1411_s26 + $0x70] sm:$0xff]  ;;  %v225_v45 = vrot.slane %v182_v37, 1  ;;  %v184_v46 = vld [vmem:[%s1411_s26 + $0x78] sm:$0x1]  ;;  %v185_v49 = vld [vmem:[%s1411_s26 + $0x80] sm:$0xff] }
  0x21   : > { %1140 = vmatpush3.bf16.msra.mxu1 %v1137_v8  ;;  %1076 = vmatprep.mubr.msk.f32.mxu1 %vm233_vm0, %v214_v36  ;;  %v220_v43 = vsel %vm205_vm1, %v218_v28, %v219_v34  ;;  %v223_v47 = vsel %vm205_vm1, %v221_v39, %v222_v41  ;;  %v227_v48 = vrot.slane %v183_v44, 1  ;;  %v228_v50 = vrot.slane %v184_v46, 1  ;;  %v186_v53 = vld [vmem:[%s1411_s26 + $0x88] sm:$0x1] }
  0x22   : > { %1111 = vmatprep.mubr.msk.f32.mxu0 %vm233_vm0, %v179_v31  ;;  %v226_v51 = vsel %vm205_vm1, %v224_v42, %v225_v45  ;;  %v596_v54 = vrot.slane %v185_v49, 1  ;;  %v597_v55 = vrot.slane %v186_v53, 1 }
  0x23   : > { %v229_v52 = vsel %vm205_vm1, %v227_v48, %v228_v50 }
  0x24   : > { %1077 = vmatmul.mubr.msk.f32.gmra.mrb[2].mxu1 %vm233_vm0, %v217_v38  ;;  %1112 = vmatmul.mubr.msk.f32.gmra.mrb[4].mxu0 %vm233_vm0, %v181_v40  ;;  %v598_v56 = vsel %vm205_vm1, %v596_v54, %v597_v55 }
  0x25   : > { %1079 = vmatprep.mubr.msk.f32.mxu1 %vm233_vm0, %v220_v43  ;;  %1114 = vmatprep.mubr.msk.f32.mxu0 %vm233_vm0, %v183_v44 }
  0x28   : > { %1080 = vmatmul.mubr.msk.f32.gmra.mrb[4].mxu1 %vm233_vm0, %v223_v47  ;;  %1115 = vmatmul.mubr.msk.f32.gmra.mrb[6].mxu0 %vm233_vm0, %v185_v49 }
  0x29   : > { %1082 = vmatprep.mubr.msk.f32.mxu1 %vm233_vm0, %v226_v51  ;;  %1121 = vmatprep.mubr.msk.f32.mxu0 %vm233_vm0, %v211_v33 }
  0x2c   : > { %1083 = vmatmul.mubr.msk.f32.gmra.mrb[6].mxu1 %vm233_vm0, %v229_v52  ;;  %1122 = vmatmul.mubr.msk.f32.vlgmr.msra.gmra.mrb[0].mxu0 %vm233_vm0, %v214_v36 }
  0x2d   : > { %1089 = vmatprep.mubr.msk.f32.mxu1 %vm233_vm0, %v169_v14  ;;  %1124 = vmatprep.mubr.msk.f32.mxu0 %vm233_vm0, %v217_v38 }
  0x30   : > { %1090 = vmatmul.mubr.msk.f32.vlgmr.msra.gmra.mrb[0].mxu1 %vm233_vm0, %v1414_v12  ;;  %1125 = vmatmul.mubr.msk.f32.gmra.mrb[2].mxu0 %vm233_vm0, %v220_v43 }
  0x31   : > { %1092 = vmatprep.mubr.msk.f32.mxu1 %vm233_vm0, %v1417_v13  ;;  %1127 = vmatprep.mubr.msk.f32.mxu0 %vm233_vm0, %v223_v47 }
  0x34   : > { %1093 = vmatmul.mubr.msk.f32.gmra.mrb[2].mxu1 %vm233_vm0, %v1425_v18  ;;  %1128 = vmatmul.mubr.msk.f32.gmra.mrb[4].mxu0 %vm233_vm0, %v226_v51 }
  0x35   : > { %1095 = vmatprep.mubr.msk.f32.mxu1 %vm233_vm0, %v177_v24  ;;  %1130 = vmatprep.mubr.msk.f32.mxu0 %vm233_vm0, %v229_v52 }
  0x38   : > { %1096 = vmatmul.mubr.msk.f32.gmra.mrb[4].mxu1 %vm233_vm0, %v179_v31  ;;  %1131 = vmatmul.mubr.msk.f32.gmra.mrb[6].mxu0 %vm233_vm0, %v598_v56 }
  0x39   : > { %1098 = vmatprep.mubr.msk.f32.mxu1 %vm233_vm0, %v181_v40 }
  0x3c   : > { %1099 = vmatmul.mubr.msk.f32.gmra.mrb[6].mxu1 %vm233_vm0, %v183_v44 }
  0xff   : > { %v1123_v1 = vpop.f32.mrb[0].mxu0 }
 0x100   : > { %v670_v2 = vpop.f32.mrb[1].mxu0 }
 0x103   : > { %v1091_v4 = vpop.f32.mrb[0].mxu1  ;;  %v1126_v5 = vpop.f32.mrb[2].mxu0 }
 0x104   : > { %v1149_v6 = vadd.f32 %v1123_v1, %v1091_v4  ;;  %v437_v7 = vpop.f32.mrb[1].mxu1  ;;  %v680_v8 = vpop.f32.mrb[3].mxu0 }
 0x105   : > { %v1150_v9 = vadd.f32 %v670_v2, %v437_v7 }
 0x106   : > { %v723_v10 = vadd.f32 %v1149_v6, %v721_v3 }
 0x107   : > { %v722_v11 = vadd.f32 %v1150_v9, %v721_v3  ;;  %v1094_v12 = vpop.f32.mrb[2].mxu1  ;;  %v1129_v13 = vpop.f32.mrb[4].mxu0 }
 0x108   : > { %v739_v14 = vmul.f32 0.70710677, %v723_v10  ;;  %v1151_v15 = vadd.f32 %v1126_v5, %v1094_v12  ;;  %v447_v16 = vpop.f32.mrb[3].mxu1  ;;  %v690_v17 = vpop.f32.mrb[5].mxu0  ;;  %v731_v44 = vmul.f32 0.5, %v723_v10 }
 0x109   : > { %v738_v18 = vmul.f32 0.70710677, %v722_v11  ;;  %v1152_v19 = vadd.f32 %v680_v8, %v447_v16  ;;  %v730_v50 = vmul.f32 0.5, %v722_v11 }
 0x10a   : > { %1215 = verf.f32 %v739_v14  ;;  %v725_v20 = vadd.f32 %v1151_v15, %v721_v3 }
 0x10b   : > { %1217 = verf.f32 %v738_v18  ;;  %v724_v21 = vadd.f32 %v1152_v19, %v721_v3  ;;  %v1097_v22 = vpop.f32.mrb[4].mxu1  ;;  %v1132_v23 = vpop.f32.mrb[6].mxu0 }
 0x10c   : > { %v741_v24 = vmul.f32 0.70710677, %v725_v20  ;;  %v1153_v25 = vadd.f32 %v1129_v13, %v1097_v22  ;;  %v457_v26 = vpop.f32.mrb[5].mxu1  ;;  %v700_v27 = vpop.f32.mrb[7].mxu0  ;;  %v733_v51 = vmul.f32 0.5, %v725_v20  ;;  %v803_v13 = vand.u32 127, %v718_v57 }
 0x10d   : > { %v740_v28 = vmul.f32 0.70710677, %v724_v21  ;;  %v1154_v29 = vadd.f32 %v690_v17, %v457_v26  ;;  %v732_v59 = vmul.f32 0.5, %v724_v21 }
 0x10e   : > { %1219 = verf.f32 %v741_v24  ;;  %v727_v30 = vadd.f32 %v1153_v25, %v721_v3  ;;  %vm804_vm2 = vcmp.lt.s32.totalorder %v803_v13, 8 }
 0x10f   : > { %1221 = verf.f32 %v740_v28  ;;  %v726_v31 = vadd.f32 %v1154_v29, %v721_v3  ;;  %v1100_v32 = vpop.f32.mrb[6].mxu1 }
 0x110   : > { %v743_v33 = vmul.f32 0.70710677, %v727_v30  ;;  %v1155_v34 = vadd.f32 %v1132_v23, %v1100_v32  ;;  %v467_v35 = vpop.f32.mrb[7].mxu1  ;;  %v735_v5 = vmul.f32 0.5, %v727_v30 }
 0x111   : > { %v742_v36 = vmul.f32 0.70710677, %v726_v31  ;;  %v1156_v37 = vadd.f32 %v700_v27, %v467_v35  ;;  %v734_v60 = vmul.f32 0.5, %v726_v31 }
 0x112   : > { %1223 = verf.f32 %v743_v33  ;;  %v729_v38 = vadd.f32 %v1155_v34, %v721_v3 }
 0x113   : > { %1225 = verf.f32 %v742_v36  ;;  %v728_v39 = vadd.f32 %v1156_v37, %v721_v3 }
 0x114   : > { %v1216_v40 = vpop.eup %1215  ;;  %v745_v41 = vmul.f32 0.70710677, %v729_v38  ;;  %v737_v11 = vmul.f32 0.5, %v729_v38 }
 0x115   : > { %v1218_v42 = vpop.eup %1217  ;;  %v744_v43 = vmul.f32 0.70710677, %v728_v39  ;;  %v755_v45 = vadd.f32 1.0, %v1216_v40  ;;  %v736_v6 = vmul.f32 0.5, %v728_v39 }
 0x116   : > { %1227 = verf.f32 %v745_v41  ;;  %v754_v47 = vadd.f32 1.0, %v1218_v42 }
 0x117   : > { %1229 = verf.f32 %v744_v43  ;;  %v763_v46 = vmul.f32 %v755_v45, %v731_v44 }
 0x118   : > { %v1220_v48 = vpop.eup %1219  ;;  %v762_v53 = vmul.f32 %v754_v47, %v730_v50 }
 0x119   : > { %v1222_v49 = vpop.eup %1221  ;;  %772 = vadd.xlane.f32.xlu0 %v763_v46  ;;  %v757_v52 = vadd.f32 1.0, %v1220_v48 }
 0x11a   : > { %v756_v55 = vadd.f32 1.0, %v1222_v49 }
 0x11b   : > { %v765_v54 = vmul.f32 %v757_v52, %v733_v51 }
 0x11c   : > { %v1224_v56 = vpop.eup %1223  ;;  %v764_v0 = vmul.f32 %v756_v55, %v732_v59 }
 0x11d   : > { %v1226_v58 = vpop.eup %1225  ;;  %770 = vadd.xlane.f32.xlu0 %v762_v53  ;;  %776 = vadd.xlane.f32.xlu1 %v765_v54  ;;  %v759_v1 = vadd.f32 1.0, %v1224_v56 }
 0x11e   : > { %v758_v61 = vadd.f32 1.0, %v1226_v58 }
 0x11f   : > { %v767_v8 = vmul.f32 %v759_v1, %v735_v5 }
 0x120   : > { %v1228_v2 = vpop.eup %1227  ;;  %v766_v3 = vmul.f32 %v758_v61, %v734_v60 }
 0x121   : > { %v1230_v4 = vpop.eup %1229  ;;  %774 = vadd.xlane.f32.xlu1 %v764_v0  ;;  %v761_v9 = vadd.f32 1.0, %v1228_v2 }
 0x122   : > { %778 = vadd.xlane.f32.xlu0 %v766_v3  ;;  %v760_v7 = vadd.f32 1.0, %v1230_v4 }
 0x123   : > { %v769_v12 = vmul.f32 %v761_v9, %v737_v11 }
 0x124   : > { %v768_v10 = vmul.f32 %v760_v7, %v736_v6 }
 0x125   : > { %780 = vadd.xlane.f32.xlu1 %v767_v8 }
 0x126   : > { %782 = vadd.xlane.f32.xlu0 %v768_v10 }
 0x129   : > { %784 = vadd.xlane.f32.xlu1 %v769_v12 }
 0x1a6   : > { %v773_v14 = vpop.xlane.xlu0 %772 }
 0x1a7   : > { %v787_v15 = vmul.f32 0.125, %v773_v14 }
 0x1a9   : > { %v795_v16 = vsub.f32 %v763_v46, %v787_v15 }
 0x1aa   : > { %v771_v17 = vpop.xlane.xlu0 %770  ;;  %v777_v18 = vpop.xlane.xlu1 %776 }
 0x1ab   : > { %v786_v19 = vmul.f32 0.125, %v771_v17  ;;  %v789_v20 = vmul.f32 0.125, %v777_v18  ;;  %v1497_v21 = vsel %vm804_vm2, %v795_v16, 0.0 }
 0x1ac   : > { %v816_v22 = vmul.f32 %v1497_v21, %v1497_v21 }
 0x1ad   : > { %v794_v23 = vsub.f32 %v762_v53, %v786_v19  ;;  %v797_v24 = vsub.f32 %v765_v54, %v789_v20 }
 0x1ae   : > { %v775_v25 = vpop.xlane.xlu1 %774  ;;  %825 = vadd.xlane.f32.xlu1 %v816_v22 }
 0x1af   : > { %v788_v26 = vmul.f32 0.125, %v775_v25  ;;  %v779_v57 = vpop.xlane.xlu0 %778  ;;  %v1502_v27 = vsel %vm804_vm2, %v797_v24, 0.0  ;;  %v1505_v28 = vsel %vm804_vm2, %v794_v23, 0.0 }
 0x1b0   : > { %v790_v29 = vmul.f32 0.125, %v779_v57  ;;  %v818_v30 = vmul.f32 %v1502_v27, %v1502_v27  ;;  %v815_v31 = vmul.f32 %v1505_v28, %v1505_v28 }
 0x1b1   : > { %v796_v32 = vsub.f32 %v764_v0, %v788_v26 }
 0x1b2   : > { %v798_v33 = vsub.f32 %v766_v3, %v790_v29  ;;  %v781_v34 = vpop.xlane.xlu1 %780  ;;  %829 = vadd.xlane.f32.xlu1 %v818_v30  ;;  %823 = vadd.xlane.f32.xlu0 %v815_v31 }
 0x1b3   : > { %v791_v35 = vmul.f32 0.125, %v781_v34  ;;  %v783_v36 = vpop.xlane.xlu0 %782  ;;  %v1512_v37 = vsel %vm804_vm2, %v796_v32, 0.0 }
 0x1b4   : > { %v792_v38 = vmul.f32 0.125, %v783_v36  ;;  %v817_v39 = vmul.f32 %v1512_v37, %v1512_v37  ;;  %v1517_v41 = vsel %vm804_vm2, %v798_v33, 0.0 }
 0x1b5   : > { %v799_v40 = vsub.f32 %v767_v8, %v791_v35  ;;  %v819_v47 = vmul.f32 %v1517_v41, %v1517_v41 }
 0x1b6   : > { %v800_v42 = vsub.f32 %v768_v10, %v792_v38  ;;  %v785_v43 = vpop.xlane.xlu1 %784  ;;  %827 = vadd.xlane.f32.xlu0 %v817_v39 }
 0x1b7   : > { %v793_v44 = vmul.f32 0.125, %v785_v43  ;;  %v1520_v45 = vsel %vm804_vm2, %v799_v40, 0.0 }
 0x1b8   : > { %v820_v46 = vmul.f32 %v1520_v45, %v1520_v45  ;;  %v1527_v49 = vsel %vm804_vm2, %v800_v42, 0.0 }
 0x1b9   : > { %v801_v48 = vsub.f32 %v769_v12, %v793_v44  ;;  %v821_v52 = vmul.f32 %v1527_v49, %v1527_v49 }
 0x1ba   : > { %833 = vadd.xlane.f32.xlu1 %v820_v46  ;;  %831 = vadd.xlane.f32.xlu0 %v819_v47 }
 0x1bb   : > { %v1530_v50 = vsel %vm804_vm2, %v801_v48, 0.0 }
 0x1bc   : > { %v822_v51 = vmul.f32 %v1530_v50, %v1530_v50 }
 0x1be   : > { %837 = vadd.xlane.f32.xlu1 %v822_v51  ;;  %835 = vadd.xlane.f32.xlu0 %v821_v52 }
 0x23b   : > { %v826_v53 = vpop.xlane.xlu1 %825 }
 0x23c   : > { %v840_v54 = vmul.f32 0.125, %v826_v53 }
 0x23e   : > { %v848_v55 = vadd.f32 1e-05, %v840_v54 }
 0x23f   : > { %v830_v56 = vpop.xlane.xlu1 %829  ;;  %v824_v58 = vpop.xlane.xlu0 %823 }
 0x240   : > { %1231 = vrsqrt.f32 %v848_v55  ;;  %v842_v59 = vmul.f32 0.125, %v830_v56  ;;  %v839_v60 = vmul.f32 0.125, %v824_v58 }
 0x242   : > { %v850_v61 = vadd.f32 1e-05, %v842_v59  ;;  %v847_v0 = vadd.f32 1e-05, %v839_v60 }
 0x243   : > { %v828_v1 = vpop.xlane.xlu0 %827 }
 0x244   : > { %1233 = vrsqrt.f32 %v850_v61  ;;  %v841_v2 = vmul.f32 0.125, %v828_v1 }
 0x245   : > { %1235 = vrsqrt.f32 %v847_v0 }
 0x246   : > { %v849_v3 = vadd.f32 1e-05, %v841_v2 }
 0x247   : > { %v834_v4 = vpop.xlane.xlu1 %833  ;;  %v832_v5 = vpop.xlane.xlu0 %831 }
 0x248   : > { %1237 = vrsqrt.f32 %v849_v3  ;;  %v844_v6 = vmul.f32 0.125, %v834_v4  ;;  %v843_v7 = vmul.f32 0.125, %v832_v5 }
 0x24a   : > { %v1232_v8 = vpop.eup %1231  ;;  %v852_v9 = vadd.f32 1e-05, %v844_v6  ;;  %v851_v10 = vadd.f32 1e-05, %v843_v7 }
 0x24b   : > { %v864_v11 = vmul.f32 %v1232_v8, %v1497_v21  ;;  %v838_v12 = vpop.xlane.xlu1 %837  ;;  %v836_v13 = vpop.xlane.xlu0 %835 }
 0x24c   : > { %1239 = vrsqrt.f32 %v852_v9  ;;  %v846_v14 = vmul.f32 0.125, %v838_v12  ;;  %v845_v15 = vmul.f32 0.125, %v836_v13 }
 0x24d   : > { %v876_v16 = vmul.f32 %v1491_v62, %v864_v11  ;;  %1241 = vrsqrt.f32 %v851_v10 }
 0x24e   : > { %v1234_v17 = vpop.eup %1233  ;;  %v854_v18 = vadd.f32 1e-05, %v846_v14  ;;  %v853_v19 = vadd.f32 1e-05, %v845_v15 }
 0x24f   : > { %v1236_v20 = vpop.eup %1235  ;;  %v888_v22 = vadd.f32 %v1493_v63, %v876_v16  ;;  %v866_v23 = vmul.f32 %v1234_v17, %v1502_v27 }
 0x250   : > { %v863_v24 = vmul.f32 %v1236_v20, %v1505_v28  ;;  %1243 = vrsqrt.f32 %v854_v18 }
 0x251   : > { %896 = vst [vmem:[%s1544_s4 + $0x8] sm:$0xff] %v888_v22  ;;  %v878_v21 = vmul.f32 %v1491_v62, %v866_v23  ;;  %1245 = vrsqrt.f32 %v853_v19 }
 0x252   : > { %v1238_v25 = vpop.eup %1237  ;;  %v875_v26 = vmul.f32 %v1491_v62, %v863_v24 }
 0x253   : > { %v890_v57 = vadd.f32 %v1493_v63, %v878_v21  ;;  %v865_v27 = vmul.f32 %v1238_v25, %v1512_v37 }
 0x254   : > { %v887_v28 = vadd.f32 %v1493_v63, %v875_v26 }
 0x255   : > { %898 = vst [vmem:[%s1544_s4 + $0x18] sm:$0xff] %v890_v57  ;;  %v877_v29 = vmul.f32 %v1491_v62, %v865_v27 }
 0x256   : > { %v1240_v30 = vpop.eup %1239  ;;  %895 = vst [vmem:[%s1544_s4] sm:$0xff] %v887_v28 }
 0x257   : > { %v1242_v31 = vpop.eup %1241  ;;  %v889_v32 = vadd.f32 %v1493_v63, %v877_v29  ;;  %v868_v33 = vmul.f32 %v1240_v30, %v1520_v45 }
 0x258   : > { %v867_v34 = vmul.f32 %v1242_v31, %v1517_v41 }
 0x259   : > { %897 = vst [vmem:[%s1544_s4 + $0x10] sm:$0xff] %v889_v32  ;;  %v880_v35 = vmul.f32 %v1491_v62, %v868_v33 }
 0x25a   : > { %v1244_v36 = vpop.eup %1243  ;;  %v879_v37 = vmul.f32 %v1491_v62, %v867_v34 }
 0x25b   : > { %v1246_v38 = vpop.eup %1245  ;;  %v892_v39 = vadd.f32 %v1493_v63, %v880_v35  ;;  %v870_v40 = vmul.f32 %v1244_v36, %v1530_v50 }
 0x25c   : > { %v891_v42 = vadd.f32 %v1493_v63, %v879_v37  ;;  %v869_v43 = vmul.f32 %v1246_v38, %v1527_v49 }
 0x25d   : > { %900 = vst [vmem:[%s1544_s4 + $0x28] sm:$0xff] %v892_v39  ;;  %v882_v41 = vmul.f32 %v1491_v62, %v870_v40 }
 0x25e   : > { %899 = vst [vmem:[%s1544_s4 + $0x20] sm:$0xff] %v891_v42  ;;  %v881_v44 = vmul.f32 %v1491_v62, %v869_v43 }
 0x25f   : > { %v894_v45 = vadd.f32 %v1493_v63, %v882_v41 }
 0x260   : > { %v893_v46 = vadd.f32 %v1493_v63, %v881_v44 }
 0x261   : > { %902 = vst [vmem:[%s1544_s4 + $0x38] sm:$0xff] %v894_v45 }
 0x262   : > { %901 = vst [vmem:[%s1544_s4 + $0x30] sm:$0xff] %v893_v46 }
 0x263   : > { %1260 = shalt.err (!%p1257_p3)
}
 0x264   : > { %s1261_s20 = scalar_lea.hbm %s1575_s9, 1024  ;;  %s1265_s26 = scalar_lea.hbm %s1628_s3, 2048 }
 0x265   : > { %p1262_p4 = scmp.ne.s32.totalorder %s1575_s9, %s1261_s20  ;;  %p1266_p9 = scmp.lt.u32.totalorder %s1575_s9, %s1628_s3 }
 0x266   : > { %p1267_p10 = scmp.lt.u32.totalorder %s1265_s26, %s1261_s20  ;;  %p1269_p12 = scmp.lt.u32.totalorder %s1261_s20, %s1575_s9 }
 0x267   : > { %p1263_p7 = pnand %p1262_p4, %p1372_p5 }
 0x268   : > { %p1268_p11 = por %p1267_p10, %p1266_p9 }
 0x269   : > { %p1264_p8 = pneg %p1263_p7 }
 0x26a   : > { %p1270_p13 = por %p1269_p12, %p1268_p11 }
 0x26c   : > { %p1271_p0 = pnand %p1270_p13, %p1264_p8 }
 0x26e   : > { %1274 = shalt.err (!%p1271_p0)
}
 0x26f   : > { %s1312_s29 = smov 128   ;;  %s1313_s30 = smov 8  }
 0x270   : > { %1174 = dma.vmem_to_hbm [thread:$0]  (%p1372_p5), %s1577_s6, 1024, %s1575_s9, %s1584_s16, %s1312_s29, %s1312_s29, %s1313_s30  }
 0x271 PF: > { %p1180_p1 = scmp.ge.s32.totalorder %s1309_s15, 2  ;;  %s932_s4 = sand.u32 1, %s1297_s12  }
 0x272   : > { %s933_s5 = scalar_lea.sflag [#allocation3], %s932_s4 }
 0x273   : > { %p1177_p2 = pnand %p1180_p1, %p1376_p6 }
 0x275   : > { %1292 = dma.done.wait (!%p1177_p2), %s933_s5, 1024  }
 0x276   : > { %1294 = vsyncadd (!%p1177_p2), %s933_s5, 4294966272  ;;  %p13_p3 = scmp.ge.s32.totalorder %s1359_s18, 4   ;;  %s1631_s12 = smov %s1301_s13 }
 0x277   : > { %s1632_s13 = smov %s1305_s14  ;;  %s1633_s14 = smov %s1370_s21 }
 0x278   : > { %s1634_s15 = smov %s1359_s18  ;;  %15 = sbr.rel (!%p13_p3) target bundleno = 3 (0x3), region = 70 }
 0x27f   :  { %938 = vsyncpa [#allocation3], 1 }
 0x280   :  { %940 = vsyncpa [#allocation3 + $0x1], 1 }

</bundles_post_ra>
